<compile_context>
chip_gen: v7x
topology: tpu7x:2x2x1
jax: 0.10.0
libtpu: 0.0.40
codegen_flags: <defaults>
</compile_context>

<pallas_src>
import math
import jax
import jax.numpy as jnp
from jax.experimental import pallas as pl
from jax.experimental.pallas import tpu as pltpu


def _round_up(a, m):
    return (a + m - 1) // m * m


def _padded_bytes(shape, dtype):
    """Rough VMEM footprint of one buffer: last dim -> x128 lanes, 2nd-last -> x8."""
    s = list(shape)
    s[-1] = _round_up(int(s[-1]), 128)
    if len(s) >= 2:
        s[-2] = _round_up(int(s[-2]), 8)
    n = 1
    for d in s:
        n *= int(d)
    return n * jnp.dtype(dtype).itemsize


def _vmem_capacity_bytes():
    try:
        info = pltpu.get_tpu_info()
        cap = getattr(info, "vmem_capacity_bytes", None)
        if cap:
            return int(cap)
    except Exception:
        pass
    return 64 * 1024 * 1024  # conservative: v7x per-TensorCore VMEM


def _make_lstm_kernel(seq_len, t_blk, needs_mask, unroll):
    """Kernel factory closing over static config."""

    def kernel(x_ref, w_ref, u_ref, b_ref, h0_ref, c0_ref,
               hseq_ref, h_ref, c_ref, gx_ref):
        # x_ref   : (t_blk, B_TILE, D)   time-major input chunk
        # w_ref   : (D, 4H)              resident, gate order [i,f,o,g]
        # u_ref   : (H, 4H)              resident, gate order [i,f,o,g]
        # b_ref   : (1, 4H)              resident bias (f32)
        # h0_ref  : (B_TILE, H)          initial hidden state
        # c0_ref  : (B_TILE, H)          initial cell state
        # hseq_ref: (t_blk, B_TILE, H)   per-timestep hidden outputs (time-major)
        # h_ref   : (B_TILE, H)          final hidden state (resident carry)
        # c_ref   : (B_TILE, H)          final cell state   (resident carry)
        # gx_ref  : (t_blk*B_TILE, 4H)   f32 scratch for the chunk input projection
        t = pl.program_id(1)

        @pl.when(t == 0)
        def _():
            h_ref[...] = h0_ref[...]
            c_ref[...] = c0_ref[...]

        tb, b_tile, d = x_ref.shape
        H = h_ref.shape[-1]

        # ---- chunk-wide input projection: ONE MXU matmul per chunk -----------
        w = w_ref[...]
        xc = x_ref[...].reshape(tb * b_tile, d).astype(w.dtype)
        gx_ref[...] = (jnp.dot(xc, w, preferred_element_type=jnp.float32)
                       + b_ref[...].astype(jnp.float32))

        u = u_ref[...]
        h_init = h_ref[...].astype(jnp.float32)
        c_init = c_ref[...].astype(jnp.float32)

        # ---- serial recurrence over the chunk (fori_loop carries h, c) -------
        def step(tt, carry):
            h, c = carry
            row0 = tt * b_tile
            if not isinstance(row0, int):
                row0 = pl.multiple_of(row0, b_tile)
            gates = gx_ref[pl.ds(row0, b_tile), :] + jnp.dot(
                h.astype(u.dtype), u, preferred_element_type=jnp.float32)
            sig = jax.nn.sigmoid(gates[:, :3 * H])   # [i | f | o] as one slab
            g_t = jnp.tanh(gates[:, 3 * H:])         # g
            i_t = sig[:, :H]
            f_t = sig[:, H:2 * H]
            o_t = sig[:, 2 * H:3 * H]
            c_new = f_t * c + i_t * g_t
            h_new = o_t * jnp.tanh(c_new)
            if needs_mask:
                # Padded timesteps (t*t_blk + tt >= seq_len) must not advance state.
                valid = (t * t_blk + tt) < seq_len
                c_new = jnp.where(valid, c_new, c)
                h_new = jnp.where(valid, h_new, h)
            hseq_ref[tt] = h_new.astype(hseq_ref.dtype)
            return h_new, c_new

        h_f, c_f = jax.lax.fori_loop(0, tb, step, (h_init, c_init),
                                     unroll=unroll)
        h_ref[...] = h_f.astype(h_ref.dtype)
        c_ref[...] = c_f.astype(c_ref.dtype)

    return kernel


def custom_lstm_exp1(x, W, U, bias, init_states=None, *,
                     t_blk=32, b_tile_max=128, param_dtype=None):
    """x: (bs, seq, input_dim). Returns (hidden_seq, (h_T, c_T)) like the module."""
    bs, seq_len, input_dim = x.shape
    H = U.shape[0]
    assert W.shape == (input_dim, 4 * H)
    assert U.shape == (H, 4 * H)
    assert bias.shape == (4 * H,)
    dtype = x.dtype

    if init_states is None:
        h0 = jnp.zeros((bs, H), dtype)
        c0 = jnp.zeros((bs, H), dtype)
    else:
        h0, c0 = init_states
        h0 = h0.astype(dtype)
        c0 = c0.astype(dtype)

    if seq_len == 0:
        return jnp.zeros((bs, 0, H), dtype), (h0, c0)

    # --- gate reorder [i,f,g,o] -> [i,f,o,g]: sigmoid on :3H, tanh on 3H: ----
    def reorder(m):
        return jnp.concatenate(
            [m[..., :2 * H], m[..., 3 * H:], m[..., 2 * H:3 * H]], axis=-1)

    W_r = reorder(W)
    U_r = reorder(U)
    b_r = reorder(bias).astype(jnp.float32).reshape(1, 4 * H)
    if param_dtype is not None:
        W_r = W_r.astype(param_dtype)
        U_r = U_r.astype(param_dtype)

    # --- batch tile: MXU-shaped when bs allows, multiple of 8 sublanes --------
    b_tile_max = max(8, _round_up(b_tile_max, 8))
    B_TILE = min(b_tile_max, _round_up(max(bs, 1), 8))
    bs_p = _round_up(bs, B_TILE)
    n_btiles = bs_p // B_TILE

    # --- time chunk: pad seq to a multiple of t_blk; clamp t_blk to VMEM ------
    t_blk = max(1, min(int(t_blk), seq_len))

    def _vmem_need(tb):
        need = 2 * _padded_bytes((tb, B_TILE, input_dim), x.dtype)      # x chunk
        need += 2 * _padded_bytes((input_dim, 4 * H), W_r.dtype)        # W blocks
        need += 2 * _padded_bytes((H, 4 * H), U_r.dtype)                # U blocks
        need += 2 * _padded_bytes((1, 4 * H), jnp.float32)              # bias
        need += 4 * 2 * _padded_bytes((B_TILE, H), dtype)               # h0,c0,h,c
        need += 2 * _padded_bytes((tb, B_TILE, H), dtype)               # hseq chunk
        need += _padded_bytes((tb * B_TILE, 4 * H), jnp.float32)        # gx scratch
        return need

    vmem_cap = _vmem_capacity_bytes()
    budget = int(vmem_cap * 0.70)
    while t_blk > 1 and _vmem_need(t_blk) > budget:
        t_blk -= 1
    need = _vmem_need(t_blk)
    vmem_limit = int(max(16 * 1024 * 1024,
                         min(int(need * 1.5) + (2 << 20), int(vmem_cap * 0.9))))

    seq_p = _round_up(seq_len, t_blk)
    n_chunks = seq_p // t_blk
    needs_mask = (seq_p != seq_len)
    unroll = bool(t_blk <= 8)

    # --- pad and lay x out time-major (fuses with the pad in XLA) -------------
    x_p = jnp.pad(x, ((0, bs_p - bs), (0, seq_p - seq_len), (0, 0)))
    x_tm = jnp.transpose(x_p, (1, 0, 2))                 # (seq_p, bs_p, D)
    h0_p = jnp.pad(h0, ((0, bs_p - bs), (0, 0)))
    c0_p = jnp.pad(c0, ((0, bs_p - bs), (0, 0)))

    out_shapes = (
        jax.ShapeDtypeStruct((seq_p, bs_p, H), dtype),   # hidden_seq (time-major)
        jax.ShapeDtypeStruct((bs_p, H), dtype),          # h_T
        jax.ShapeDtypeStruct((bs_p, H), dtype),          # c_T
    )

    grid_spec = pltpu.PrefetchScalarGridSpec(
        num_scalar_prefetch=0,
        grid=(n_btiles, n_chunks),   # batch tiles (parallel) x time chunks (serial)
        in_specs=[
            pl.BlockSpec((t_blk, B_TILE, input_dim), lambda b, t: (t, b, 0)),  # x
            pl.BlockSpec((input_dim, 4 * H), lambda b, t: (0, 0)),             # W
            pl.BlockSpec((H, 4 * H), lambda b, t: (0, 0)),                     # U
            pl.BlockSpec((1, 4 * H), lambda b, t: (0, 0)),                     # bias
            pl.BlockSpec((B_TILE, H), lambda b, t: (b, 0)),                    # h0
            pl.BlockSpec((B_TILE, H), lambda b, t: (b, 0)),                    # c0
        ],
        out_specs=[
            pl.BlockSpec((t_blk, B_TILE, H), lambda b, t: (t, b, 0)),          # hseq
            pl.BlockSpec((B_TILE, H), lambda b, t: (b, 0)),                    # h_T
            pl.BlockSpec((B_TILE, H), lambda b, t: (b, 0)),                    # c_T
        ],
        scratch_shapes=[pltpu.VMEM((t_blk * B_TILE, 4 * H), jnp.float32)],
    )

    kernel = _make_lstm_kernel(seq_len, t_blk, needs_mask, unroll)

    hseq_tm, h_T, c_T = pl.pallas_call(
        kernel,
        out_shape=out_shapes,
        grid_spec=grid_spec,
        compiler_params=pltpu.CompilerParams(
            dimension_semantics=("parallel", "arbitrary"),
            vmem_limit_bytes=vmem_limit,
        ),
    )(x_tm, W_r, U_r, b_r, h0_p, c0_p)

    hidden_seq = jnp.transpose(hseq_tm[:seq_len], (1, 0, 2))[:bs]
    return hidden_seq, (h_T[:bs], c_T[:bs])


def _reference_lstm(x, W, U, bias):
    """Pure-JAX reference mirroring the PyTorch forward loop (original gate order)."""
    bs, seq_len, _ = x.shape
    HS = U.shape[0]
    hp = jax.lax.Precision.HIGHEST
    h = jnp.zeros((bs, HS), jnp.float32)
    c = jnp.zeros((bs, HS), jnp.float32)
    hs = []
    for t in range(seq_len):
        gates = (jnp.dot(x[:, t, :], W, precision=hp)
                 + jnp.dot(h, U, precision=hp) + bias)
        i = jax.nn.sigmoid(gates[:, :HS])
        f = jax.nn.sigmoid(gates[:, HS:2 * HS])
        g = jnp.tanh(gates[:, 2 * HS:3 * HS])
        o = jax.nn.sigmoid(gates[:, 3 * HS:])
        c = f * c + i * g
        h = o * jnp.tanh(c)
        hs.append(h)
    return jnp.stack(hs, axis=1), (h, c)


if __name__ == "__main__":
    # Small shapes consistent with the module: batch=2, seq=8, input_dim=16, hidden=32
    bs, seq_len, input_dim, hidden_dim = 2, 8, 16, 32

    key = jax.random.PRNGKey(0)
    kx, kw, ku, kb, kx2 = jax.random.split(key, 5)

    stdv = 1.0 / math.sqrt(hidden_dim)
    W = jax.random.uniform(kw, (input_dim, 4 * hidden_dim), jnp.float32, -stdv, stdv)
    U = jax.random.uniform(ku, (hidden_dim, 4 * hidden_dim), jnp.float32, -stdv, stdv)
    bias = jax.random.uniform(kb, (4 * hidden_dim,), jnp.float32, -stdv, stdv)
    x = jax.random.normal(kx, (bs, seq_len, input_dim), jnp.float32)

    # --- f32 path -------------------------------------------------------------
    run = jax.jit(lambda x, W, U, b: custom_lstm_exp1(x, W, U, b))
    hidden_seq, (h_T, c_T) = run(x, W, U, bias)
    jax.block_until_ready((hidden_seq, h_T, c_T))

    ref_seq, (ref_h, ref_c) = _reference_lstm(x, W, U, bias)
    assert hidden_seq.shape == (bs, seq_len, hidden_dim)
    assert jnp.allclose(hidden_seq, ref_seq, atol=1e-4, rtol=1e-3)
    assert jnp.allclose(h_T, ref_h, atol=1e-4, rtol=1e-3)
    assert jnp.allclose(c_T, ref_c, atol=1e-4, rtol=1e-3)

    # --- multi batch-tile + multi chunk + seq padding/mask path ----------------
    bs2, seq2 = 12, 11
    x2 = jax.random.normal(kx2, (bs2, seq2, input_dim), jnp.float32)
    run2 = jax.jit(lambda x, W, U, b: custom_lstm_exp1(x, W, U, b,
                                                       t_blk=4, b_tile_max=8))
    hs2, (h2, c2) = run2(x2, W, U, bias)
    jax.block_until_ready((hs2, h2, c2))
    ref2_seq, (ref2_h, ref2_c) = _reference_lstm(x2, W, U, bias)
    assert hs2.shape == (bs2, seq2, hidden_dim)
    assert jnp.allclose(hs2, ref2_seq, atol=1e-4, rtol=1e-3)
    assert jnp.allclose(h2, ref2_h, atol=1e-4, rtol=1e-3)
    assert jnp.allclose(c2, ref2_c, atol=1e-4, rtol=1e-3)

    # --- bf16-weights path (halves W/U VMEM residency & HBM traffic) ----------
    run_bf16 = jax.jit(lambda x, W, U, b: custom_lstm_exp1(
        x, W, U, b, param_dtype=jnp.bfloat16))
    hs_b, (h_b, c_b) = run_bf16(x, W, U, bias)
    jax.block_until_ready((hs_b, h_b, c_b))
    assert jnp.allclose(hs_b, ref_seq, atol=5e-2, rtol=5e-2)
    assert jnp.allclose(h_b, ref_h, atol=5e-2, rtol=5e-2)

    print("KERNEL_OK")
</pallas_src>

<mosaic_0001>
module attributes {stable_mosaic.version = 11 : i64} {
  func.func @kernel(%arg0: i32, %arg1: i32, %arg2: memref<8x8x16xf32, #tpu.memory_space<vmem>>, %arg3: memref<16x128xf32, #tpu.memory_space<vmem>>, %arg4: memref<32x128xf32, #tpu.memory_space<vmem>>, %arg5: memref<1x128xf32, #tpu.memory_space<vmem>>, %arg6: memref<8x32xf32, #tpu.memory_space<vmem>>, %arg7: memref<8x32xf32, #tpu.memory_space<vmem>>, %arg8: memref<8x8x32xf32, #tpu.memory_space<vmem>>, %arg9: memref<8x32xf32, #tpu.memory_space<vmem>>, %arg10: memref<8x32xf32, #tpu.memory_space<vmem>>, %arg11: memref<64x128xf32, #tpu.memory_space<vmem>>) attributes {dimension_semantics = [#tpu.dimension_semantics<parallel>, #tpu.dimension_semantics<arbitrary>], iteration_bounds = array<i64: 1, 1>, scalar_prefetch = 0 : i64, scratch_operands = 1 : i64, tpu.core_type = #tpu.core_type<tc>, window_params = [{transform_indices = @transform_0, window_bounds = array<i64: 8, 8, 16>}, {pipeline_mode = #tpu.pipeline_mode<synchronous>, transform_indices = @transform_1, window_bounds = array<i64: 16, 128>}, {pipeline_mode = #tpu.pipeline_mode<synchronous>, transform_indices = @transform_2, window_bounds = array<i64: 32, 128>}, {pipeline_mode = #tpu.pipeline_mode<synchronous>, transform_indices = @transform_3, window_bounds = array<i64: 1, 128>}, {transform_indices = @transform_4, window_bounds = array<i64: 8, 32>}, {transform_indices = @transform_5, window_bounds = array<i64: 8, 32>}, {transform_indices = @transform_6, window_bounds = array<i64: 8, 8, 32>}, {transform_indices = @transform_7, window_bounds = array<i64: 8, 32>}, {transform_indices = @transform_8, window_bounds = array<i64: 8, 32>}]} {
    %c0_i32 = arith.constant 0 : i32
    %0 = arith.cmpi eq, %arg1, %c0_i32 : i32
    %1 = arith.extui %0 : i1 to i32
    %c0_i32_0 = arith.constant 0 : i32
    %2 = arith.cmpi ne, %1, %c0_i32_0 : i32
    scf.if %2 {
      %c0_68 = arith.constant 0 : index
      %c0_69 = arith.constant 0 : index
      %224 = vector.load %arg6[%c0_68, %c0_69] : memref<8x32xf32, #tpu.memory_space<vmem>>, vector<8x32xf32>
      %c0_70 = arith.constant 0 : index
      %c0_71 = arith.constant 0 : index
      %225 = vector.load %arg9[%c0_70, %c0_71] : memref<8x32xf32, #tpu.memory_space<vmem>>, vector<8x32xf32>
      tpu.vector_store %arg9[%c0_70, %c0_71], %224 {strides = array<i32>} : memref<8x32xf32, #tpu.memory_space<vmem>>, vector<8x32xf32>,
      %c0_72 = arith.constant 0 : index
      %c0_73 = arith.constant 0 : index
      %226 = vector.load %arg7[%c0_72, %c0_73] : memref<8x32xf32, #tpu.memory_space<vmem>>, vector<8x32xf32>
      %c0_74 = arith.constant 0 : index
      %c0_75 = arith.constant 0 : index
      %227 = vector.load %arg10[%c0_74, %c0_75] : memref<8x32xf32, #tpu.memory_space<vmem>>, vector<8x32xf32>
      tpu.vector_store %arg10[%c0_74, %c0_75], %226 {strides = array<i32>} : memref<8x32xf32, #tpu.memory_space<vmem>>, vector<8x32xf32>,
    } else {
    }
    %c0 = arith.constant 0 : index
    %c0_1 = arith.constant 0 : index
    %3 = vector.load %arg3[%c0, %c0_1] : memref<16x128xf32, #tpu.memory_space<vmem>>, vector<16x128xf32>
    %c0_2 = arith.constant 0 : index
    %c0_3 = arith.constant 0 : index
    %c0_4 = arith.constant 0 : index
    %4 = vector.load %arg2[%c0_2, %c0_3, %c0_4] : memref<8x8x16xf32, #tpu.memory_space<vmem>>, vector<8x8x16xf32>
    %5 = vector.shape_cast %4 : vector<8x8x16xf32> to vector<64x16xf32>
    %cst = arith.constant dense<0.000000e+00> : vector<64x128xf32>
    %6 = tpu.matmul %5, %3, %cst {dimension_numbers = #tpu.dot_dimension_numbers<[1], [0], [0], [1], [0, 0, 1, 1], [], []>} : vector<64x16xf32>, vector<16x128xf32>, vector<64x128xf32> -> vector<64x128xf32>
    %c0_5 = arith.constant 0 : index
    %c0_6 = arith.constant 0 : index
    %7 = vector.load %arg5[%c0_5, %c0_6] : memref<1x128xf32, #tpu.memory_space<vmem>>, vector<1x128xf32>
    %8 = vector.broadcast %7 : vector<1x128xf32> to vector<64x128xf32>
    %9 = arith.addf %6, %8 : vector<64x128xf32>
    %c0_7 = arith.constant 0 : index
    %c0_8 = arith.constant 0 : index
    %10 = vector.load %arg11[%c0_7, %c0_8] : memref<64x128xf32, #tpu.memory_space<vmem>>, vector<64x128xf32>
    tpu.vector_store %arg11[%c0_7, %c0_8], %9 {strides = array<i32>} : memref<64x128xf32, #tpu.memory_space<vmem>>, vector<64x128xf32>,
    %c0_9 = arith.constant 0 : index
    %c0_10 = arith.constant 0 : index
    %11 = vector.load %arg4[%c0_9, %c0_10] : memref<32x128xf32, #tpu.memory_space<vmem>>, vector<32x128xf32>
    %c0_11 = arith.constant 0 : index
    %c0_12 = arith.constant 0 : index
    %12 = vector.load %arg9[%c0_11, %c0_12] : memref<8x32xf32, #tpu.memory_space<vmem>>, vector<8x32xf32>
    %c0_13 = arith.constant 0 : index
    %c0_14 = arith.constant 0 : index
    %13 = vector.load %arg10[%c0_13, %c0_14] : memref<8x32xf32, #tpu.memory_space<vmem>>, vector<8x32xf32>
    %c0_i32_15 = arith.constant 0 : i32
    %c8_i32 = arith.constant 8 : i32
    %14 = arith.muli %c0_i32_15, %c8_i32 : i32
    %15 = tpu.assume_multiple %14, 8 : i32
    %16 = arith.index_cast %15 : i32 to index
    %c0_16 = arith.constant 0 : index
    %17 = vector.load %arg11[%16, %c0_16] : memref<64x128xf32, #tpu.memory_space<vmem>>, vector<8x128xf32>
    %cst_17 = arith.constant dense<0.000000e+00> : vector<8x128xf32>
    %18 = tpu.matmul %12, %11, %cst_17 {dimension_numbers = #tpu.dot_dimension_numbers<[1], [0], [0], [1], [0, 0, 1, 1], [], []>} : vector<8x32xf32>, vector<32x128xf32>, vector<8x128xf32> -> vector<8x128xf32>
    %19 = arith.addf %17, %18 : vector<8x128xf32>
    %20 = vector.extract_strided_slice %19 {offsets = [0, 0], sizes = [8, 96], strides = [1, 1]} : vector<8x128xf32> to vector<8x96xf32>
    %21 = arith.negf %20 : vector<8x96xf32>
    %22 = math.exp %21 : vector<8x96xf32>
    %cst_18 = arith.constant 1.000000e+00 : f32
    %23 = vector.broadcast %cst_18 : f32 to vector<8x96xf32>
    %24 = arith.addf %23, %22 : vector<8x96xf32>
    %25 = arith.divf %23, %24 : vector<8x96xf32>
    %26 = vector.extract_strided_slice %19 {offsets = [0, 96], sizes = [8, 32], strides = [1, 1]} : vector<8x128xf32> to vector<8x32xf32>
    %27 = math.tanh %26 : vector<8x32xf32>
    %28 = vector.extract_strided_slice %25 {offsets = [0, 0], sizes = [8, 32], strides = [1, 1]} : vector<8x96xf32> to vector<8x32xf32>
    %29 = vector.extract_strided_slice %25 {offsets = [0, 32], sizes = [8, 32], strides = [1, 1]} : vector<8x96xf32> to vector<8x32xf32>
    %30 = vector.extract_strided_slice %25 {offsets = [0, 64], sizes = [8, 32], strides = [1, 1]} : vector<8x96xf32> to vector<8x32xf32>
    %31 = arith.mulf %29, %13 : vector<8x32xf32>
    %32 = arith.mulf %28, %27 : vector<8x32xf32>
    %33 = arith.addf %31, %32 : vector<8x32xf32>
    %34 = math.tanh %33 : vector<8x32xf32>
    %35 = arith.mulf %30, %34 : vector<8x32xf32>
    %36 = arith.index_cast %c0_i32_15 : i32 to index
    %c0_19 = arith.constant 0 : index
    %c0_20 = arith.constant 0 : index
    %37 = vector.load %arg8[%36, %c0_19, %c0_20] : memref<8x8x32xf32, #tpu.memory_space<vmem>>, vector<1x8x32xf32>
    %38 = vector.shape_cast %37 : vector<1x8x32xf32> to vector<8x32xf32>
    %39 = vector.shape_cast %35 : vector<8x32xf32> to vector<1x8x32xf32>
    tpu.vector_store %arg8[%36, %c0_19, %c0_20], %39 {strides = array<i32>} : memref<8x8x32xf32, #tpu.memory_space<vmem>>, vector<1x8x32xf32>,
    %c1_i32 = arith.constant 1 : i32
    %c8_i32_21 = arith.constant 8 : i32
    %40 = arith.muli %c1_i32, %c8_i32_21 : i32
    %41 = tpu.assume_multiple %40, 8 : i32
    %42 = arith.index_cast %41 : i32 to index
    %c0_22 = arith.constant 0 : index
    %43 = vector.load %arg11[%42, %c0_22] : memref<64x128xf32, #tpu.memory_space<vmem>>, vector<8x128xf32>
    %cst_23 = arith.constant dense<0.000000e+00> : vector<8x128xf32>
    %44 = tpu.matmul %35, %11, %cst_23 {dimension_numbers = #tpu.dot_dimension_numbers<[1], [0], [0], [1], [0, 0, 1, 1], [], []>} : vector<8x32xf32>, vector<32x128xf32>, vector<8x128xf32> -> vector<8x128xf32>
    %45 = arith.addf %43, %44 : vector<8x128xf32>
    %46 = vector.extract_strided_slice %45 {offsets = [0, 0], sizes = [8, 96], strides = [1, 1]} : vector<8x128xf32> to vector<8x96xf32>
    %47 = arith.negf %46 : vector<8x96xf32>
    %48 = math.exp %47 : vector<8x96xf32>
    %cst_24 = arith.constant 1.000000e+00 : f32
    %49 = vector.broadcast %cst_24 : f32 to vector<8x96xf32>
    %50 = arith.addf %49, %48 : vector<8x96xf32>
    %51 = arith.divf %49, %50 : vector<8x96xf32>
    %52 = vector.extract_strided_slice %45 {offsets = [0, 96], sizes = [8, 32], strides = [1, 1]} : vector<8x128xf32> to vector<8x32xf32>
    %53 = math.tanh %52 : vector<8x32xf32>
    %54 = vector.extract_strided_slice %51 {offsets = [0, 0], sizes = [8, 32], strides = [1, 1]} : vector<8x96xf32> to vector<8x32xf32>
    %55 = vector.extract_strided_slice %51 {offsets = [0, 32], sizes = [8, 32], strides = [1, 1]} : vector<8x96xf32> to vector<8x32xf32>
    %56 = vector.extract_strided_slice %51 {offsets = [0, 64], sizes = [8, 32], strides = [1, 1]} : vector<8x96xf32> to vector<8x32xf32>
    %57 = arith.mulf %55, %33 : vector<8x32xf32>
    %58 = arith.mulf %54, %53 : vector<8x32xf32>
    %59 = arith.addf %57, %58 : vector<8x32xf32>
    %60 = math.tanh %59 : vector<8x32xf32>
    %61 = arith.mulf %56, %60 : vector<8x32xf32>
    %62 = arith.index_cast %c1_i32 : i32 to index
    %c0_25 = arith.constant 0 : index
    %c0_26 = arith.constant 0 : index
    %63 = vector.load %arg8[%62, %c0_25, %c0_26] : memref<8x8x32xf32, #tpu.memory_space<vmem>>, vector<1x8x32xf32>
    %64 = vector.shape_cast %63 : vector<1x8x32xf32> to vector<8x32xf32>
    %65 = vector.shape_cast %61 : vector<8x32xf32> to vector<1x8x32xf32>
    tpu.vector_store %arg8[%62, %c0_25, %c0_26], %65 {strides = array<i32>} : memref<8x8x32xf32, #tpu.memory_space<vmem>>, vector<1x8x32xf32>,
    %c2_i32 = arith.constant 2 : i32
    %c8_i32_27 = arith.constant 8 : i32
    %66 = arith.muli %c2_i32, %c8_i32_27 : i32
    %67 = tpu.assume_multiple %66, 8 : i32
    %68 = arith.index_cast %67 : i32 to index
    %c0_28 = arith.constant 0 : index
    %69 = vector.load %arg11[%68, %c0_28] : memref<64x128xf32, #tpu.memory_space<vmem>>, vector<8x128xf32>
    %cst_29 = arith.constant dense<0.000000e+00> : vector<8x128xf32>
    %70 = tpu.matmul %61, %11, %cst_29 {dimension_numbers = #tpu.dot_dimension_numbers<[1], [0], [0], [1], [0, 0, 1, 1], [], []>} : vector<8x32xf32>, vector<32x128xf32>, vector<8x128xf32> -> vector<8x128xf32>
    %71 = arith.addf %69, %70 : vector<8x128xf32>
    %72 = vector.extract_strided_slice %71 {offsets = [0, 0], sizes = [8, 96], strides = [1, 1]} : vector<8x128xf32> to vector<8x96xf32>
    %73 = arith.negf %72 : vector<8x96xf32>
    %74 = math.exp %73 : vector<8x96xf32>
    %cst_30 = arith.constant 1.000000e+00 : f32
    %75 = vector.broadcast %cst_30 : f32 to vector<8x96xf32>
    %76 = arith.addf %75, %74 : vector<8x96xf32>
    %77 = arith.divf %75, %76 : vector<8x96xf32>
    %78 = vector.extract_strided_slice %71 {offsets = [0, 96], sizes = [8, 32], strides = [1, 1]} : vector<8x128xf32> to vector<8x32xf32>
    %79 = math.tanh %78 : vector<8x32xf32>
    %80 = vector.extract_strided_slice %77 {offsets = [0, 0], sizes = [8, 32], strides = [1, 1]} : vector<8x96xf32> to vector<8x32xf32>
    %81 = vector.extract_strided_slice %77 {offsets = [0, 32], sizes = [8, 32], strides = [1, 1]} : vector<8x96xf32> to vector<8x32xf32>
    %82 = vector.extract_strided_slice %77 {offsets = [0, 64], sizes = [8, 32], strides = [1, 1]} : vector<8x96xf32> to vector<8x32xf32>
    %83 = arith.mulf %81, %59 : vector<8x32xf32>
    %84 = arith.mulf %80, %79 : vector<8x32xf32>
    %85 = arith.addf %83, %84 : vector<8x32xf32>
    %86 = math.tanh %85 : vector<8x32xf32>
    %87 = arith.mulf %82, %86 : vector<8x32xf32>
    %88 = arith.index_cast %c2_i32 : i32 to index
    %c0_31 = arith.constant 0 : index
    %c0_32 = arith.constant 0 : index
    %89 = vector.load %arg8[%88, %c0_31, %c0_32] : memref<8x8x32xf32, #tpu.memory_space<vmem>>, vector<1x8x32xf32>
    %90 = vector.shape_cast %89 : vector<1x8x32xf32> to vector<8x32xf32>
    %91 = vector.shape_cast %87 : vector<8x32xf32> to vector<1x8x32xf32>
    tpu.vector_store %arg8[%88, %c0_31, %c0_32], %91 {strides = array<i32>} : memref<8x8x32xf32, #tpu.memory_space<vmem>>, vector<1x8x32xf32>,
    %c3_i32 = arith.constant 3 : i32
    %c8_i32_33 = arith.constant 8 : i32
    %92 = arith.muli %c3_i32, %c8_i32_33 : i32
    %93 = tpu.assume_multiple %92, 8 : i32
    %94 = arith.index_cast %93 : i32 to index
    %c0_34 = arith.constant 0 : index
    %95 = vector.load %arg11[%94, %c0_34] : memref<64x128xf32, #tpu.memory_space<vmem>>, vector<8x128xf32>
    %cst_35 = arith.constant dense<0.000000e+00> : vector<8x128xf32>
    %96 = tpu.matmul %87, %11, %cst_35 {dimension_numbers = #tpu.dot_dimension_numbers<[1], [0], [0], [1], [0, 0, 1, 1], [], []>} : vector<8x32xf32>, vector<32x128xf32>, vector<8x128xf32> -> vector<8x128xf32>
    %97 = arith.addf %95, %96 : vector<8x128xf32>
    %98 = vector.extract_strided_slice %97 {offsets = [0, 0], sizes = [8, 96], strides = [1, 1]} : vector<8x128xf32> to vector<8x96xf32>
    %99 = arith.negf %98 : vector<8x96xf32>
    %100 = math.exp %99 : vector<8x96xf32>
    %cst_36 = arith.constant 1.000000e+00 : f32
    %101 = vector.broadcast %cst_36 : f32 to vector<8x96xf32>
    %102 = arith.addf %101, %100 : vector<8x96xf32>
    %103 = arith.divf %101, %102 : vector<8x96xf32>
    %104 = vector.extract_strided_slice %97 {offsets = [0, 96], sizes = [8, 32], strides = [1, 1]} : vector<8x128xf32> to vector<8x32xf32>
    %105 = math.tanh %104 : vector<8x32xf32>
    %106 = vector.extract_strided_slice %103 {offsets = [0, 0], sizes = [8, 32], strides = [1, 1]} : vector<8x96xf32> to vector<8x32xf32>
    %107 = vector.extract_strided_slice %103 {offsets = [0, 32], sizes = [8, 32], strides = [1, 1]} : vector<8x96xf32> to vector<8x32xf32>
    %108 = vector.extract_strided_slice %103 {offsets = [0, 64], sizes = [8, 32], strides = [1, 1]} : vector<8x96xf32> to vector<8x32xf32>
    %109 = arith.mulf %107, %85 : vector<8x32xf32>
    %110 = arith.mulf %106, %105 : vector<8x32xf32>
    %111 = arith.addf %109, %110 : vector<8x32xf32>
    %112 = math.tanh %111 : vector<8x32xf32>
    %113 = arith.mulf %108, %112 : vector<8x32xf32>
    %114 = arith.index_cast %c3_i32 : i32 to index
    %c0_37 = arith.constant 0 : index
    %c0_38 = arith.constant 0 : index
    %115 = vector.load %arg8[%114, %c0_37, %c0_38] : memref<8x8x32xf32, #tpu.memory_space<vmem>>, vector<1x8x32xf32>
    %116 = vector.shape_cast %115 : vector<1x8x32xf32> to vector<8x32xf32>
    %117 = vector.shape_cast %113 : vector<8x32xf32> to vector<1x8x32xf32>
    tpu.vector_store %arg8[%114, %c0_37, %c0_38], %117 {strides = array<i32>} : memref<8x8x32xf32, #tpu.memory_space<vmem>>, vector<1x8x32xf32>,
    %c4_i32 = arith.constant 4 : i32
    %c8_i32_39 = arith.constant 8 : i32
    %118 = arith.muli %c4_i32, %c8_i32_39 : i32
    %119 = tpu.assume_multiple %118, 8 : i32
    %120 = arith.index_cast %119 : i32 to index
    %c0_40 = arith.constant 0 : index
    %121 = vector.load %arg11[%120, %c0_40] : memref<64x128xf32, #tpu.memory_space<vmem>>, vector<8x128xf32>
    %cst_41 = arith.constant dense<0.000000e+00> : vector<8x128xf32>
    %122 = tpu.matmul %113, %11, %cst_41 {dimension_numbers = #tpu.dot_dimension_numbers<[1], [0], [0], [1], [0, 0, 1, 1], [], []>} : vector<8x32xf32>, vector<32x128xf32>, vector<8x128xf32> -> vector<8x128xf32>
    %123 = arith.addf %121, %122 : vector<8x128xf32>
    %124 = vector.extract_strided_slice %123 {offsets = [0, 0], sizes = [8, 96], strides = [1, 1]} : vector<8x128xf32> to vector<8x96xf32>
    %125 = arith.negf %124 : vector<8x96xf32>
    %126 = math.exp %125 : vector<8x96xf32>
    %cst_42 = arith.constant 1.000000e+00 : f32
    %127 = vector.broadcast %cst_42 : f32 to vector<8x96xf32>
    %128 = arith.addf %127, %126 : vector<8x96xf32>
    %129 = arith.divf %127, %128 : vector<8x96xf32>
    %130 = vector.extract_strided_slice %123 {offsets = [0, 96], sizes = [8, 32], strides = [1, 1]} : vector<8x128xf32> to vector<8x32xf32>
    %131 = math.tanh %130 : vector<8x32xf32>
    %132 = vector.extract_strided_slice %129 {offsets = [0, 0], sizes = [8, 32], strides = [1, 1]} : vector<8x96xf32> to vector<8x32xf32>
    %133 = vector.extract_strided_slice %129 {offsets = [0, 32], sizes = [8, 32], strides = [1, 1]} : vector<8x96xf32> to vector<8x32xf32>
    %134 = vector.extract_strided_slice %129 {offsets = [0, 64], sizes = [8, 32], strides = [1, 1]} : vector<8x96xf32> to vector<8x32xf32>
    %135 = arith.mulf %133, %111 : vector<8x32xf32>
    %136 = arith.mulf %132, %131 : vector<8x32xf32>
    %137 = arith.addf %135, %136 : vector<8x32xf32>
    %138 = math.tanh %137 : vector<8x32xf32>
    %139 = arith.mulf %134, %138 : vector<8x32xf32>
    %140 = arith.index_cast %c4_i32 : i32 to index
    %c0_43 = arith.constant 0 : index
    %c0_44 = arith.constant 0 : index
    %141 = vector.load %arg8[%140, %c0_43, %c0_44] : memref<8x8x32xf32, #tpu.memory_space<vmem>>, vector<1x8x32xf32>
    %142 = vector.shape_cast %141 : vector<1x8x32xf32> to vector<8x32xf32>
    %143 = vector.shape_cast %139 : vector<8x32xf32> to vector<1x8x32xf32>
    tpu.vector_store %arg8[%140, %c0_43, %c0_44], %143 {strides = array<i32>} : memref<8x8x32xf32, #tpu.memory_space<vmem>>, vector<1x8x32xf32>,
    %c5_i32 = arith.constant 5 : i32
    %c8_i32_45 = arith.constant 8 : i32
    %144 = arith.muli %c5_i32, %c8_i32_45 : i32
    %145 = tpu.assume_multiple %144, 8 : i32
    %146 = arith.index_cast %145 : i32 to index
    %c0_46 = arith.constant 0 : index
    %147 = vector.load %arg11[%146, %c0_46] : memref<64x128xf32, #tpu.memory_space<vmem>>, vector<8x128xf32>
    %cst_47 = arith.constant dense<0.000000e+00> : vector<8x128xf32>
    %148 = tpu.matmul %139, %11, %cst_47 {dimension_numbers = #tpu.dot_dimension_numbers<[1], [0], [0], [1], [0, 0, 1, 1], [], []>} : vector<8x32xf32>, vector<32x128xf32>, vector<8x128xf32> -> vector<8x128xf32>
    %149 = arith.addf %147, %148 : vector<8x128xf32>
    %150 = vector.extract_strided_slice %149 {offsets = [0, 0], sizes = [8, 96], strides = [1, 1]} : vector<8x128xf32> to vector<8x96xf32>
    %151 = arith.negf %150 : vector<8x96xf32>
    %152 = math.exp %151 : vector<8x96xf32>
    %cst_48 = arith.constant 1.000000e+00 : f32
    %153 = vector.broadcast %cst_48 : f32 to vector<8x96xf32>
    %154 = arith.addf %153, %152 : vector<8x96xf32>
    %155 = arith.divf %153, %154 : vector<8x96xf32>
    %156 = vector.extract_strided_slice %149 {offsets = [0, 96], sizes = [8, 32], strides = [1, 1]} : vector<8x128xf32> to vector<8x32xf32>
    %157 = math.tanh %156 : vector<8x32xf32>
    %158 = vector.extract_strided_slice %155 {offsets = [0, 0], sizes = [8, 32], strides = [1, 1]} : vector<8x96xf32> to vector<8x32xf32>
    %159 = vector.extract_strided_slice %155 {offsets = [0, 32], sizes = [8, 32], strides = [1, 1]} : vector<8x96xf32> to vector<8x32xf32>
    %160 = vector.extract_strided_slice %155 {offsets = [0, 64], sizes = [8, 32], strides = [1, 1]} : vector<8x96xf32> to vector<8x32xf32>
    %161 = arith.mulf %159, %137 : vector<8x32xf32>
    %162 = arith.mulf %158, %157 : vector<8x32xf32>
    %163 = arith.addf %161, %162 : vector<8x32xf32>
    %164 = math.tanh %163 : vector<8x32xf32>
    %165 = arith.mulf %160, %164 : vector<8x32xf32>
    %166 = arith.index_cast %c5_i32 : i32 to index
    %c0_49 = arith.constant 0 : index
    %c0_50 = arith.constant 0 : index
    %167 = vector.load %arg8[%166, %c0_49, %c0_50] : memref<8x8x32xf32, #tpu.memory_space<vmem>>, vector<1x8x32xf32>
    %168 = vector.shape_cast %167 : vector<1x8x32xf32> to vector<8x32xf32>
    %169 = vector.shape_cast %165 : vector<8x32xf32> to vector<1x8x32xf32>
    tpu.vector_store %arg8[%166, %c0_49, %c0_50], %169 {strides = array<i32>} : memref<8x8x32xf32, #tpu.memory_space<vmem>>, vector<1x8x32xf32>,
    %c6_i32 = arith.constant 6 : i32
    %c8_i32_51 = arith.constant 8 : i32
    %170 = arith.muli %c6_i32, %c8_i32_51 : i32
    %171 = tpu.assume_multiple %170, 8 : i32
    %172 = arith.index_cast %171 : i32 to index
    %c0_52 = arith.constant 0 : index
    %173 = vector.load %arg11[%172, %c0_52] : memref<64x128xf32, #tpu.memory_space<vmem>>, vector<8x128xf32>
    %cst_53 = arith.constant dense<0.000000e+00> : vector<8x128xf32>
    %174 = tpu.matmul %165, %11, %cst_53 {dimension_numbers = #tpu.dot_dimension_numbers<[1], [0], [0], [1], [0, 0, 1, 1], [], []>} : vector<8x32xf32>, vector<32x128xf32>, vector<8x128xf32> -> vector<8x128xf32>
    %175 = arith.addf %173, %174 : vector<8x128xf32>
    %176 = vector.extract_strided_slice %175 {offsets = [0, 0], sizes = [8, 96], strides = [1, 1]} : vector<8x128xf32> to vector<8x96xf32>
    %177 = arith.negf %176 : vector<8x96xf32>
    %178 = math.exp %177 : vector<8x96xf32>
    %cst_54 = arith.constant 1.000000e+00 : f32
    %179 = vector.broadcast %cst_54 : f32 to vector<8x96xf32>
    %180 = arith.addf %179, %178 : vector<8x96xf32>
    %181 = arith.divf %179, %180 : vector<8x96xf32>
    %182 = vector.extract_strided_slice %175 {offsets = [0, 96], sizes = [8, 32], strides = [1, 1]} : vector<8x128xf32> to vector<8x32xf32>
    %183 = math.tanh %182 : vector<8x32xf32>
    %184 = vector.extract_strided_slice %181 {offsets = [0, 0], sizes = [8, 32], strides = [1, 1]} : vector<8x96xf32> to vector<8x32xf32>
    %185 = vector.extract_strided_slice %181 {offsets = [0, 32], sizes = [8, 32], strides = [1, 1]} : vector<8x96xf32> to vector<8x32xf32>
    %186 = vector.extract_strided_slice %181 {offsets = [0, 64], sizes = [8, 32], strides = [1, 1]} : vector<8x96xf32> to vector<8x32xf32>
    %187 = arith.mulf %185, %163 : vector<8x32xf32>
    %188 = arith.mulf %184, %183 : vector<8x32xf32>
    %189 = arith.addf %187, %188 : vector<8x32xf32>
    %190 = math.tanh %189 : vector<8x32xf32>
    %191 = arith.mulf %186, %190 : vector<8x32xf32>
    %192 = arith.index_cast %c6_i32 : i32 to index
    %c0_55 = arith.constant 0 : index
    %c0_56 = arith.constant 0 : index
    %193 = vector.load %arg8[%192, %c0_55, %c0_56] : memref<8x8x32xf32, #tpu.memory_space<vmem>>, vector<1x8x32xf32>
    %194 = vector.shape_cast %193 : vector<1x8x32xf32> to vector<8x32xf32>
    %195 = vector.shape_cast %191 : vector<8x32xf32> to vector<1x8x32xf32>
    tpu.vector_store %arg8[%192, %c0_55, %c0_56], %195 {strides = array<i32>} : memref<8x8x32xf32, #tpu.memory_space<vmem>>, vector<1x8x32xf32>,
    %c7_i32 = arith.constant 7 : i32
    %c8_i32_57 = arith.constant 8 : i32
    %196 = arith.muli %c7_i32, %c8_i32_57 : i32
    %197 = tpu.assume_multiple %196, 8 : i32
    %198 = arith.index_cast %197 : i32 to index
    %c0_58 = arith.constant 0 : index
    %199 = vector.load %arg11[%198, %c0_58] : memref<64x128xf32, #tpu.memory_space<vmem>>, vector<8x128xf32>
    %cst_59 = arith.constant dense<0.000000e+00> : vector<8x128xf32>
    %200 = tpu.matmul %191, %11, %cst_59 {dimension_numbers = #tpu.dot_dimension_numbers<[1], [0], [0], [1], [0, 0, 1, 1], [], []>} : vector<8x32xf32>, vector<32x128xf32>, vector<8x128xf32> -> vector<8x128xf32>
    %201 = arith.addf %199, %200 : vector<8x128xf32>
    %202 = vector.extract_strided_slice %201 {offsets = [0, 0], sizes = [8, 96], strides = [1, 1]} : vector<8x128xf32> to vector<8x96xf32>
    %203 = arith.negf %202 : vector<8x96xf32>
    %204 = math.exp %203 : vector<8x96xf32>
    %cst_60 = arith.constant 1.000000e+00 : f32
    %205 = vector.broadcast %cst_60 : f32 to vector<8x96xf32>
    %206 = arith.addf %205, %204 : vector<8x96xf32>
    %207 = arith.divf %205, %206 : vector<8x96xf32>
    %208 = vector.extract_strided_slice %201 {offsets = [0, 96], sizes = [8, 32], strides = [1, 1]} : vector<8x128xf32> to vector<8x32xf32>
    %209 = math.tanh %208 : vector<8x32xf32>
    %210 = vector.extract_strided_slice %207 {offsets = [0, 0], sizes = [8, 32], strides = [1, 1]} : vector<8x96xf32> to vector<8x32xf32>
    %211 = vector.extract_strided_slice %207 {offsets = [0, 32], sizes = [8, 32], strides = [1, 1]} : vector<8x96xf32> to vector<8x32xf32>
    %212 = vector.extract_strided_slice %207 {offsets = [0, 64], sizes = [8, 32], strides = [1, 1]} : vector<8x96xf32> to vector<8x32xf32>
    %213 = arith.mulf %211, %189 : vector<8x32xf32>
    %214 = arith.mulf %210, %209 : vector<8x32xf32>
    %215 = arith.addf %213, %214 : vector<8x32xf32>
    %216 = math.tanh %215 : vector<8x32xf32>
    %217 = arith.mulf %212, %216 : vector<8x32xf32>
    %218 = arith.index_cast %c7_i32 : i32 to index
    %c0_61 = arith.constant 0 : index
    %c0_62 = arith.constant 0 : index
    %219 = vector.load %arg8[%218, %c0_61, %c0_62] : memref<8x8x32xf32, #tpu.memory_space<vmem>>, vector<1x8x32xf32>
    %220 = vector.shape_cast %219 : vector<1x8x32xf32> to vector<8x32xf32>
    %221 = vector.shape_cast %217 : vector<8x32xf32> to vector<1x8x32xf32>
    tpu.vector_store %arg8[%218, %c0_61, %c0_62], %221 {strides = array<i32>} : memref<8x8x32xf32, #tpu.memory_space<vmem>>, vector<1x8x32xf32>,
    %c8_i32_63 = arith.constant 8 : i32
    %c0_64 = arith.constant 0 : index
    %c0_65 = arith.constant 0 : index
    %222 = vector.load %arg9[%c0_64, %c0_65] : memref<8x32xf32, #tpu.memory_space<vmem>>, vector<8x32xf32>
    tpu.vector_store %arg9[%c0_64, %c0_65], %217 {strides = array<i32>} : memref<8x32xf32, #tpu.memory_space<vmem>>, vector<8x32xf32>,
    %c0_66 = arith.constant 0 : index
    %c0_67 = arith.constant 0 : index
    %223 = vector.load %arg10[%c0_66, %c0_67] : memref<8x32xf32, #tpu.memory_space<vmem>>, vector<8x32xf32>
    tpu.vector_store %arg10[%c0_66, %c0_67], %215 {strides = array<i32>} : memref<8x32xf32, #tpu.memory_space<vmem>>, vector<8x32xf32>,
    return
  }
  func.func @transform_0(%arg0: i32, %arg1: i32) -> (i32, i32, i32) {
    %c0_i32 = arith.constant 0 : i32
    %c0_i32_0 = arith.constant 0 : i32
    return %arg1, %arg0, %c0_i32 : i32, i32, i32
  }
  func.func @transform_1(%arg0: i32, %arg1: i32) -> (i32, i32) {
    %c0_i32 = arith.constant 0 : i32
    %c0_i32_0 = arith.constant 0 : i32
    %c0_i32_1 = arith.constant 0 : i32
    return %c0_i32, %c0_i32_0 : i32, i32
  }
  func.func @transform_2(%arg0: i32, %arg1: i32) -> (i32, i32) {
    %c0_i32 = arith.constant 0 : i32
    %c0_i32_0 = arith.constant 0 : i32
    %c0_i32_1 = arith.constant 0 : i32
    return %c0_i32, %c0_i32_0 : i32, i32
  }
  func.func @transform_3(%arg0: i32, %arg1: i32) -> (i32, i32) {
    %c0_i32 = arith.constant 0 : i32
    %c0_i32_0 = arith.constant 0 : i32
    %c0_i32_1 = arith.constant 0 : i32
    return %c0_i32, %c0_i32_0 : i32, i32
  }
  func.func @transform_4(%arg0: i32, %arg1: i32) -> (i32, i32) {
    %c0_i32 = arith.constant 0 : i32
    %c0_i32_0 = arith.constant 0 : i32
    return %arg0, %c0_i32 : i32, i32
  }
  func.func @transform_5(%arg0: i32, %arg1: i32) -> (i32, i32) {
    %c0_i32 = arith.constant 0 : i32
    %c0_i32_0 = arith.constant 0 : i32
    return %arg0, %c0_i32 : i32, i32
  }
  func.func @transform_6(%arg0: i32, %arg1: i32) -> (i32, i32, i32) {
    %c0_i32 = arith.constant 0 : i32
    %c0_i32_0 = arith.constant 0 : i32
    return %arg1, %arg0, %c0_i32 : i32, i32, i32
  }
  func.func @transform_7(%arg0: i32, %arg1: i32) -> (i32, i32) {
    %c0_i32 = arith.constant 0 : i32
    %c0_i32_0 = arith.constant 0 : i32
    return %arg0, %c0_i32 : i32, i32
  }
  func.func @transform_8(%arg0: i32, %arg1: i32) -> (i32, i32) {
    %c0_i32 = arith.constant 0 : i32
    %c0_i32_0 = arith.constant 0 : i32
    return %arg0, %c0_i32 : i32, i32
  }
}

</mosaic_0001>

<bundles_post_ra>
// kernel: _lambda_.1
= control target key start
LH: loop header
LB: loop body
LE: loop exit
PB: predicated region body
PF: predicated region fallthrough
CT: control target
= control target key end

     0   :  { %vm52_vm0 = vcmask 130048   ;;  %v1366_v0 = vmov 0.0|0.0   ;;  %vm1367_vm1 = vmmov 0   ;;  %v1368_v4 = vmov 0.0   ;;  %s1371_s10 = smov 96   ;;  %s1645_s1 = inlined_call_operand.vmem [shape: f32[16,128], index: 1, kind: input, shape index: {}]   ;;  %s1646_s2 = inlined_call_operand.vmem [shape: f32[32,128], index: 2, kind: input, shape index: {}]   ;;  %s1647_s0 = inlined_call_operand.vmem [shape: f32[8,8,16], index: 0, kind: input, shape index: {}]   ;;  %s1648_s4 = inlined_call_operand.vmem [shape: f32[8,32], index: 4, kind: input, shape index: {}, may-alias: {4,5}]   ;;  %s1649_s7 = inlined_call_operand.vmem [shape: f32[8,32], index: 7, kind: output, shape index: {1}]   ;;  %s1650_s5 = inlined_call_operand.vmem [shape: f32[8,32], index: 5, kind: input, shape index: {}, may-alias: {4,5}]   ;;  %s1651_s8 = inlined_call_operand.vmem [shape: f32[8,32], index: 8, kind: output, shape index: {2}]   ;;  %s1652_s3 = inlined_call_operand.vmem [shape: f32[1,128], index: 3, kind: input, shape index: {}]   ;;  %s1653_s6 = inlined_call_operand.vmem [shape: f32[8,8,32], index: 6, kind: output, shape index: {0}]  }
   0x1   :  { %1248 = vmatprep.subr.bf16.mxu1 %v1366_v0  ;;  %v35_v1 = vld [vmem:[%s1645_s1] sm:$0xff]  ;;  %v36_v2 = vld [vmem:[%s1645_s1 + $0x8] sm:$0xff]  ;;  %1164 = vmatprep.mubr.msk.f32.mxu1 %vm1367_vm1, %v1368_v4  ;;  %vm31_vm2 = vcmask 261120   ;;  %v192_v9 = vld [vmem:[%s1646_s2 + $0x10] sm:$0xff] }
   0x2   :  { %v190_v3 = vld [vmem:[%s1646_s2] sm:$0xff]  ;;  %v1244_v5 = vpack.c.bf16 %v36_v2, %v35_v1  ;;  %v191_v6 = vld [vmem:[%s1646_s2 + $0x8] sm:$0xff]  ;;  %v193_v10 = vld [vmem:[%s1646_s2 + $0x18] sm:$0xff] }
   0x3   :  { %v37_v7 = vld [vmem:[%s1647_s0] sm:$0xff]  ;;  %v1435_v8 = vpack.c.bf16 %v191_v6, %v190_v3  ;;  %v38_v12 = vld [vmem:[%s1647_s0 + $0x8] sm:$0xff]  ;;  %v1455_v13 = vpack.c.bf16 %v193_v10, %v192_v9  ;;  %v39_v53 = vld [vmem:[%s1647_s0 + $0x10] sm:$0xff] }
   0x4   :  { %1144 = vmatprep.mubr.msk.f32.mxu0 %vm52_vm0, %v37_v7  ;;  %v30_v11 = vld [vmem:[%s1648_s4] sm:$0xff]  ;;  %1245 = vmatprep.subr.bf16.mxu0 %v1244_v5  ;;  %v40_v54 = vld [vmem:[%s1647_s0 + $0x18] sm:$0xff]  ;;  %v42_v56 = vld [vmem:[%s1647_s0 + $0x28] sm:$0xff] }
   0x5   :  { %32 = vst.msk [vmem:[%s1649_s7] sm:$0xff] %vm31_vm2, %v30_v11  ;;  %1250 = vmatpush3.bf16.msra.mxu1 %v1435_v8  ;;  %1247 = vmatpush3.bf16.msra.mxu0 %v1244_v5  ;;  %v33_v15 = vld [vmem:[%s1650_s5] sm:$0xff]  ;;  %s1369_s5 = smov 32   ;;  %v43_v57 = vld [vmem:[%s1647_s0 + $0x30] sm:$0xff]  ;;  %v44_v58 = vld [vmem:[%s1647_s0 + $0x38] sm:$0xff] }
   0x6   :  { %1251 = vmatprep.subr.bf16.mxu1 %v1366_v0  ;;  %1260 = vmatprep.subr.bf16.mxu0 %v1366_v0  ;;  %34 = vst.msk [vmem:[%s1651_s8] sm:$0xff] %vm31_vm2, %v33_v15  ;;  %v1486_v16 = vld [vmem:[%s1652_s3] ss:$0 sm:$0xff]  ;;  %s1370_s3 = smov 64  }
   0x7   :  { %v41_v55 = vld [vmem:[%s1647_s0 + $0x20] sm:$0xff] }
   0x8   :  { %1145 = vmatmul.mubr.msk.f32.vlgmr.msra.gmra.mrb[0].mxu0 %vm52_vm0, %v38_v12 }
   0x9   :  { %1253 = vmatpush3.bf16.msra.mxu1 %v1455_v13  ;;  %1262 = vmatpush3.bf16.msra.mxu0 %v1435_v8 }
   0xa   :  { %1254 = vmatprep.subr.bf16.mxu1 %v1366_v0  ;;  %1263 = vmatprep.subr.bf16.mxu0 %v1366_v0 }
   0xb   :  { %1147 = vmatprep.mubr.msk.f32.mxu0 %vm52_vm0, %v39_v53 }
   0xc   :  { %v194_v14 = vld [vmem:[%s1649_s7] sm:$0xff]  ;;  %1148 = vmatmul.mubr.msk.f32.gmra.mrb[2].mxu0 %vm52_vm0, %v40_v54 }
   0xd   :  { %1165 = vmatmul.mubr.msk.f32.vlgmr.msra.gmra.mrb[0].mxu1 %vm31_vm2, %v194_v14  ;;  %1265 = vmatpush3.bf16.msra.mxu0 %v1455_v13  ;;  %v195_v24 = vld [vmem:[%s1651_s8] sm:$0xff] }
   0xe   :  { %1256 = vmatpush3.bf16.msra.mxu1 %v1435_v8  ;;  %1175 = vmatprep.mubr.msk.f32.mxu1 %vm1367_vm1, %v1368_v4 }
   0xf   :  { %1257 = vmatprep.subr.bf16.mxu1 %v1366_v0  ;;  %1272 = vmatprep.subr.bf16.mxu0 %v1366_v0 }
  0x10   :  { %1150 = vmatprep.mubr.msk.f32.mxu0 %vm52_vm0, %v41_v55 }
  0x11   :  { %1151 = vmatmul.mubr.msk.f32.gmra.mrb[4].mxu0 %vm52_vm0, %v42_v56 }
  0x12   :  { %1259 = vmatpush3.bf16.msra.mxu1 %v1455_v13  ;;  %1153 = vmatprep.mubr.msk.f32.mxu0 %vm52_vm0, %v43_v57 }
  0x13   :  { %1266 = vmatprep.subr.bf16.mxu1 %v1366_v0 }
  0x15   :  { %1154 = vmatmul.mubr.msk.f32.gmra.mrb[6].mxu0 %vm52_vm0, %v44_v58 }
  0x16   :  { %1186 = vmatprep.mubr.msk.f32.mxu0 %vm1367_vm1, %v1368_v4 }
  0xdb   :  { %v1146_v17 = vpop.f32.mrb[0].mxu0 }
  0xdc   :  { %v143_v18 = vpop.f32.mrb[1].mxu0  ;;  %v149_v39 = vadd.f32 %v1146_v17, %v1486_v16 }
  0xdd   :  { %v144_v19 = vadd.f32 %v1486_v16, %v143_v18 }
  0xdf   :  { %v1149_v62 = vpop.f32.mrb[2].mxu0 }
  0xe0   :  { %v267_v20 = vpop.f32.mrb[0].mxu1  ;;  %v153_v63 = vpop.f32.mrb[3].mxu0 }
  0xe1   :  { %v271_v21 = vadd.f32 %v267_v20, %v144_v19  ;;  %v1166_v22 = vpop.f32.mrb[1].mxu1  ;;  %v154_v7 = vadd.f32 %v1486_v16, %v153_v63 }
  0xe3   :  { %1302 = vtanh.f32 %v271_v21  ;;  %v1068_v25 = vmul.f32 -1.442695, %v271_v21 }
  0xe4   :  { %v1539_v1 = vpop.f32.mrb[4].mxu0 }
  0xe5   :  { %1304 = vpow2.f32 %v1068_v25  ;;  %v1541_v2 = vpop.f32.mrb[5].mxu0 }
  0xe8   :  { %v1543_v3 = vpop.f32.mrb[6].mxu0 }
  0xe9   :  { %v1545_v5 = vpop.f32.mrb[7].mxu0 }
  0xed   :  { %v1303_v23 = vpop.eup %1302 }
  0xee   :  { %285 = vrot.lane.b32.xlu0 %v1303_v23, %s1369_s5 }
  0xef   :  { %v1305_v26 = vpop.eup %1304 }
  0xf0   :  { %v275_v27 = vadd.f32 1.0, %v1305_v26 }
  0xf2   :  { %280 = vrot.lane.b32.xlu0 %v195_v24, %s1369_s5  ;;  %1306 = vrcp.f32 %v275_v27 }
  0xfc   :  { %v1307_v28 = vpop.eup %1306 }
 0x160   :  { %v286_v29 = vpop.permute.xlu0 %285 }
 0x161   :  { %v288_v30 = vmul.f32 %v1307_v28, %v286_v29 }
 0x163   :  { %290 = vrot.lane.b32.xlu1 %v288_v30, %s1369_s5 }
 0x164   :  { %v281_v31 = vpop.permute.xlu0 %280 }
 0x165   :  { %v283_v32 = vmul.f32 %v1307_v28, %v281_v31 }
 0x1d5   :  { %v291_v33 = vpop.permute.xlu1 %290 }
 0x1d6   :  { %v293_v34 = vadd.f32 %v291_v33, %v283_v32 }
 0x1d8   :  { %1308 = vtanh.f32 %v293_v34 }
 0x1e2   :  { %v1309_v35 = vpop.eup %1308 }
 0x1e3   :  { %296 = vrot.lane.b32.xlu1 %v1309_v35, %s1369_s5 }
 0x255   :  { %v297_v36 = vpop.permute.xlu1 %296 }
 0x256   :  { %v299_v37 = vmul.f32 %v1307_v28, %v297_v36  ;;  %v159_v28 = vadd.f32 %v1149_v62, %v1486_v16 }
 0x258   :  { %301 = vrot.lane.b32.xlu0 %v299_v37, %s1370_s3 }
 0x2ca   :  { %v302_v38 = vpop.permute.xlu0 %301 }
 0x2cb   :  { %304 = vst.msk [vmem:[%s1653_s6] sm:$0xff] %vm31_vm2, %v302_v38  ;;  %1176 = vmatmul.mubr.msk.f32.vlgmr.msra.gmra.mrb[2].mxu1 %vm31_vm2, %v302_v38 }
 0x2cc   :  { %1268 = vmatpush3.bf16.msra.mxu1 %v1435_v8  ;;  %1197 = vmatprep.mubr.msk.f32.mxu1 %vm1367_vm1, %v1368_v4 }
 0x2cd   :  { %1269 = vmatprep.subr.bf16.mxu1 %v1366_v0 }
 0x2d0   :  { %1271 = vmatpush3.bf16.msra.mxu1 %v1455_v13 }
 0x2d1   :  { %1278 = vmatprep.subr.bf16.mxu1 %v1366_v0 }
 0x39e   :  { %v375_v40 = vpop.f32.mrb[2].mxu1 }
 0x39f   :  { %v379_v41 = vadd.f32 %v375_v40, %v149_v39  ;;  %v1177_v42 = vpop.f32.mrb[3].mxu1 }
 0x3a1   :  { %1310 = vtanh.f32 %v379_v41  ;;  %v1070_v44 = vmul.f32 -1.442695, %v379_v41 }
 0x3a3   :  { %1312 = vpow2.f32 %v1070_v44 }
 0x3ab   :  { %v1311_v43 = vpop.eup %1310 }
 0x3ac   :  { %389 = vrot.lane.b32.xlu1 %v1311_v43, %s1369_s5 }
 0x3ad   :  { %v1313_v45 = vpop.eup %1312 }
 0x3ae   :  { %v383_v46 = vadd.f32 1.0, %v1313_v45 }
 0x3b0   :  { %1314 = vrcp.f32 %v383_v46  ;;  %v164_v46 = vadd.f32 %v1486_v16, %v1541_v2  ;;  %v169_v2 = vadd.f32 %v1539_v1, %v1486_v16 }
 0x3ba   :  { %v1315_v47 = vpop.eup %1314 }
 0x3bb   :  { %v387_v50 = vmul.f32 %v1315_v47, %v293_v34 }
 0x41e   :  { %v390_v48 = vpop.permute.xlu1 %389 }
 0x41f   :  { %v392_v49 = vmul.f32 %v1315_v47, %v390_v48 }
 0x421   :  { %394 = vrot.lane.b32.xlu0 %v392_v49, %s1369_s5 }
 0x493   :  { %v395_v51 = vpop.permute.xlu0 %394 }
 0x494   :  { %v397_v52 = vadd.f32 %v395_v51, %v387_v50 }
 0x496   :  { %1316 = vtanh.f32 %v397_v52 }
 0x4a0   :  { %v1317_v59 = vpop.eup %1316 }
 0x4a1   :  { %400 = vrot.lane.b32.xlu1 %v1317_v59, %s1369_s5 }
 0x513   :  { %v401_v60 = vpop.permute.xlu1 %400 }
 0x514   :  { %v403_v61 = vmul.f32 %v1315_v47, %v401_v60 }
 0x516   :  { %405 = vrot.lane.b32.xlu0 %v403_v61, %s1370_s3 }
 0x588   :  { %v406_v6 = vpop.permute.xlu0 %405 }
 0x589   :  { %1071 = vst.msk [vmem:[%s1653_s6 + $0x8] sm:$0xff] %vm31_vm2, %v406_v6  ;;  %1187 = vmatmul.mubr.msk.f32.vlgmr.msra.gmra.mrb[8].mxu0 %vm31_vm2, %v406_v6 }
 0x58a   :  { %1274 = vmatpush3.bf16.msra.mxu0 %v1435_v8  ;;  %1208 = vmatprep.mubr.msk.f32.mxu0 %vm1367_vm1, %v1368_v4 }
 0x58b   :  { %1275 = vmatprep.subr.bf16.mxu0 %v1366_v0 }
 0x58e   :  { %1277 = vmatpush3.bf16.msra.mxu0 %v1455_v13 }
 0x58f   :  { %1284 = vmatprep.subr.bf16.mxu0 %v1366_v0 }
 0x65c   :  { %v480_v9 = vpop.f32.mrb[8].mxu0 }
 0x65d   :  { %v484_v10 = vadd.f32 %v480_v9, %v154_v7  ;;  %v1188_v11 = vpop.f32.mrb[9].mxu0 }
 0x65f   :  { %1318 = vtanh.f32 %v484_v10  ;;  %v1073_v14 = vmul.f32 -1.442695, %v484_v10 }
 0x661   :  { %1320 = vpow2.f32 %v1073_v14 }
 0x669   :  { %v1319_v12 = vpop.eup %1318 }
 0x66a   :  { %494 = vrot.lane.b32.xlu1 %v1319_v12, %s1369_s5 }
 0x66b   :  { %v1321_v15 = vpop.eup %1320 }
 0x66c   :  { %v488_v17 = vadd.f32 1.0, %v1321_v15 }
 0x66e   :  { %1322 = vrcp.f32 %v488_v17 }
 0x678   :  { %v1323_v18 = vpop.eup %1322 }
 0x679   :  { %v492_v21 = vmul.f32 %v1323_v18, %v397_v52 }
 0x6dc   :  { %v495_v19 = vpop.permute.xlu1 %494 }
 0x6dd   :  { %v497_v20 = vmul.f32 %v1323_v18, %v495_v19 }
 0x6df   :  { %499 = vrot.lane.b32.xlu0 %v497_v20, %s1369_s5 }
 0x751   :  { %v500_v22 = vpop.permute.xlu0 %499 }
 0x752   :  { %v502_v23 = vadd.f32 %v500_v22, %v492_v21  ;;  %v174_v21 = vadd.f32 %v1486_v16, %v1545_v5 }
 0x754   :  { %1324 = vtanh.f32 %v502_v23 }
 0x75e   :  { %v1325_v24 = vpop.eup %1324 }
 0x75f   :  { %505 = vrot.lane.b32.xlu1 %v1325_v24, %s1369_s5 }
 0x7d1   :  { %v506_v25 = vpop.permute.xlu1 %505 }
 0x7d2   :  { %v508_v26 = vmul.f32 %v1323_v18, %v506_v25 }
 0x7d4   :  { %510 = vrot.lane.b32.xlu0 %v508_v26, %s1370_s3 }
 0x846   :  { %v511_v27 = vpop.permute.xlu0 %510 }
 0x847   :  { %1074 = vst.msk [vmem:[%s1653_s6 + $0x10] sm:$0xff] %vm31_vm2, %v511_v27  ;;  %1198 = vmatmul.mubr.msk.f32.vlgmr.msra.gmra.mrb[4].mxu1 %vm31_vm2, %v511_v27 }
 0x848   :  { %1280 = vmatpush3.bf16.msra.mxu1 %v1435_v8  ;;  %1219 = vmatprep.mubr.msk.f32.mxu1 %vm1367_vm1, %v1368_v4 }
 0x849   :  { %1281 = vmatprep.subr.bf16.mxu1 %v1366_v0 }
 0x84c   :  { %1283 = vmatpush3.bf16.msra.mxu1 %v1455_v13 }
 0x84d   :  { %1290 = vmatprep.subr.bf16.mxu1 %v1366_v0 }
 0x91a   :  { %v585_v29 = vpop.f32.mrb[4].mxu1 }
 0x91b   :  { %v589_v30 = vadd.f32 %v585_v29, %v159_v28  ;;  %v1199_v31 = vpop.f32.mrb[5].mxu1 }
 0x91d   :  { %1326 = vtanh.f32 %v589_v30  ;;  %v1076_v33 = vmul.f32 -1.442695, %v589_v30 }
 0x91f   :  { %1328 = vpow2.f32 %v1076_v33 }
 0x927   :  { %v1327_v32 = vpop.eup %1326 }
 0x928   :  { %599 = vrot.lane.b32.xlu1 %v1327_v32, %s1369_s5 }
 0x929   :  { %v1329_v34 = vpop.eup %1328 }
 0x92a   :  { %v593_v35 = vadd.f32 1.0, %v1329_v34 }
 0x92c   :  { %1330 = vrcp.f32 %v593_v35 }
 0x936   :  { %v1331_v36 = vpop.eup %1330 }
 0x937   :  { %v597_v39 = vmul.f32 %v1331_v36, %v502_v23 }
 0x99a   :  { %v600_v37 = vpop.permute.xlu1 %599 }
 0x99b   :  { %v602_v38 = vmul.f32 %v1331_v36, %v600_v37 }
 0x99d   :  { %604 = vrot.lane.b32.xlu0 %v602_v38, %s1369_s5  ;;  %v179_v38 = vadd.f32 %v1543_v3, %v1486_v16 }
 0xa0f   :  { %v605_v40 = vpop.permute.xlu0 %604 }
 0xa10   :  { %v607_v41 = vadd.f32 %v605_v40, %v597_v39 }
 0xa12   :  { %1332 = vtanh.f32 %v607_v41 }
 0xa1c   :  { %v1333_v42 = vpop.eup %1332 }
 0xa1d   :  { %610 = vrot.lane.b32.xlu1 %v1333_v42, %s1369_s5 }
 0xa8f   :  { %v611_v43 = vpop.permute.xlu1 %610 }
 0xa90   :  { %v613_v44 = vmul.f32 %v1331_v36, %v611_v43 }
 0xa92   :  { %615 = vrot.lane.b32.xlu0 %v613_v44, %s1370_s3 }
 0xb04   :  { %v616_v45 = vpop.permute.xlu0 %615 }
 0xb05   :  { %1077 = vst.msk [vmem:[%s1653_s6 + $0x18] sm:$0xff] %vm31_vm2, %v616_v45  ;;  %1209 = vmatmul.mubr.msk.f32.vlgmr.msra.gmra.mrb[10].mxu0 %vm31_vm2, %v616_v45 }
 0xb06   :  { %1286 = vmatpush3.bf16.msra.mxu0 %v1435_v8  ;;  %1230 = vmatprep.mubr.msk.f32.mxu0 %vm1367_vm1, %v1368_v4 }
 0xb07   :  { %1287 = vmatprep.subr.bf16.mxu0 %v1366_v0 }
 0xb0a   :  { %1289 = vmatpush3.bf16.msra.mxu0 %v1455_v13 }
 0xbd8   :  { %v690_v47 = vpop.f32.mrb[10].mxu0 }
 0xbd9   :  { %v694_v48 = vadd.f32 %v690_v47, %v164_v46  ;;  %v1210_v49 = vpop.f32.mrb[11].mxu0 }
 0xbdb   :  { %1334 = vtanh.f32 %v694_v48  ;;  %v1079_v51 = vmul.f32 -1.442695, %v694_v48 }
 0xbdd   :  { %1336 = vpow2.f32 %v1079_v51 }
 0xbe5   :  { %v1335_v50 = vpop.eup %1334 }
 0xbe6   :  { %704 = vrot.lane.b32.xlu1 %v1335_v50, %s1369_s5 }
 0xbe7   :  { %v1337_v52 = vpop.eup %1336 }
 0xbe8   :  { %v698_v53 = vadd.f32 1.0, %v1337_v52 }
 0xbea   :  { %1338 = vrcp.f32 %v698_v53 }
 0xbf4   :  { %v1339_v54 = vpop.eup %1338 }
 0xbf5   :  { %v702_v57 = vmul.f32 %v1339_v54, %v607_v41 }
 0xc58   :  { %v705_v55 = vpop.permute.xlu1 %704 }
 0xc59   :  { %v707_v56 = vmul.f32 %v1339_v54, %v705_v55 }
 0xc5b   :  { %709 = vrot.lane.b32.xlu0 %v707_v56, %s1369_s5 }
 0xccd   :  { %v710_v58 = vpop.permute.xlu0 %709 }
 0xcce   :  { %v712_v59 = vadd.f32 %v710_v58, %v702_v57 }
 0xcd0   :  { %1340 = vtanh.f32 %v712_v59 }
 0xcda   :  { %v1341_v60 = vpop.eup %1340 }
 0xcdb   :  { %715 = vrot.lane.b32.xlu1 %v1341_v60, %s1369_s5 }
 0xd4d   :  { %v716_v61 = vpop.permute.xlu1 %715 }
 0xd4e   :  { %v718_v62 = vmul.f32 %v1339_v54, %v716_v61 }
 0xd50   :  { %720 = vrot.lane.b32.xlu0 %v718_v62, %s1370_s3 }
 0xdc2   :  { %v721_v63 = vpop.permute.xlu0 %720 }
 0xdc3   :  { %1080 = vst.msk [vmem:[%s1653_s6 + $0x20] sm:$0xff] %vm31_vm2, %v721_v63  ;;  %1220 = vmatmul.mubr.msk.f32.vlgmr.msra.gmra.mrb[6].mxu1 %vm31_vm2, %v721_v63 }
 0xdc4   :  { %1292 = vmatpush3.bf16.msra.mxu1 %v1435_v8  ;;  %1241 = vmatprep.mubr.msk.f32.mxu1 %vm1367_vm1, %v1368_v4 }
 0xdc5   :  { %1293 = vmatprep.subr.bf16.mxu1 %v1366_v0 }
 0xdc8   :  { %1295 = vmatpush3.bf16.msra.mxu1 %v1455_v13 }
 0xe96   :  { %v795_v6 = vpop.f32.mrb[6].mxu1 }
 0xe97   :  { %v799_v7 = vadd.f32 %v795_v6, %v169_v2  ;;  %v1221_v9 = vpop.f32.mrb[7].mxu1 }
 0xe99   :  { %1342 = vtanh.f32 %v799_v7  ;;  %v1082_v11 = vmul.f32 -1.442695, %v799_v7 }
 0xe9b   :  { %1344 = vpow2.f32 %v1082_v11 }
 0xea3   :  { %v1343_v10 = vpop.eup %1342 }
 0xea4   :  { %809 = vrot.lane.b32.xlu1 %v1343_v10, %s1369_s5 }
 0xea5   :  { %v1345_v8 = vpop.eup %1344 }
 0xea6   :  { %v803_v12 = vadd.f32 1.0, %v1345_v8 }
 0xea8   :  { %1346 = vrcp.f32 %v803_v12 }
 0xeb2   :  { %v1347_v4 = vpop.eup %1346 }
 0xeb3   :  { %v807_v13 = vmul.f32 %v1347_v4, %v712_v59 }
 0xf16   :  { %v810_v14 = vpop.permute.xlu1 %809 }
 0xf17   :  { %v812_v0 = vmul.f32 %v1347_v4, %v810_v14 }
 0xf19   :  { %814 = vrot.lane.b32.xlu0 %v812_v0, %s1369_s5 }
 0xf8b   :  { %v815_v15 = vpop.permute.xlu0 %814 }
 0xf8c   :  { %v817_v1 = vadd.f32 %v815_v15, %v807_v13 }
 0xf8e   :  { %1348 = vtanh.f32 %v817_v1 }
 0xf98   :  { %v1349_v17 = vpop.eup %1348 }
 0xf99   :  { %820 = vrot.lane.b32.xlu1 %v1349_v17, %s1369_s5 }
0x100b   :  { %v821_v18 = vpop.permute.xlu1 %820 }
0x100c   :  { %v823_v19 = vmul.f32 %v1347_v4, %v821_v18 }
0x100e   :  { %825 = vrot.lane.b32.xlu0 %v823_v19, %s1370_s3 }
0x1080   :  { %v826_v20 = vpop.permute.xlu0 %825 }
0x1081   :  { %1083 = vst.msk [vmem:[%s1653_s6 + $0x28] sm:$0xff] %vm31_vm2, %v826_v20  ;;  %1231 = vmatmul.mubr.msk.f32.vlgmr.msra.gmra.mrb[12].mxu0 %vm31_vm2, %v826_v20 }
0x1154   :  { %v900_v22 = vpop.f32.mrb[12].mxu0 }
0x1155   :  { %v904_v23 = vadd.f32 %v900_v22, %v174_v21  ;;  %v1232_v24 = vpop.f32.mrb[13].mxu0 }
0x1157   :  { %1350 = vtanh.f32 %v904_v23  ;;  %v1085_v26 = vmul.f32 -1.442695, %v904_v23 }
0x1159   :  { %1352 = vpow2.f32 %v1085_v26 }
0x1161   :  { %v1351_v25 = vpop.eup %1350 }
0x1162   :  { %914 = vrot.lane.b32.xlu1 %v1351_v25, %s1369_s5 }
0x1163   :  { %v1353_v27 = vpop.eup %1352 }
0x1164   :  { %v908_v28 = vadd.f32 1.0, %v1353_v27 }
0x1166   :  { %1354 = vrcp.f32 %v908_v28 }
0x1170   :  { %v1355_v29 = vpop.eup %1354 }
0x1171   :  { %v912_v32 = vmul.f32 %v1355_v29, %v817_v1 }
0x11d4   :  { %v915_v30 = vpop.permute.xlu1 %914 }
0x11d5   :  { %v917_v31 = vmul.f32 %v1355_v29, %v915_v30 }
0x11d7   :  { %919 = vrot.lane.b32.xlu0 %v917_v31, %s1369_s5 }
0x1249   :  { %v920_v33 = vpop.permute.xlu0 %919 }
0x124a   :  { %v922_v5 = vadd.f32 %v920_v33, %v912_v32 }
0x124c   :  { %1356 = vtanh.f32 %v922_v5 }
0x1256   :  { %v1357_v34 = vpop.eup %1356 }
0x1257   :  { %925 = vrot.lane.b32.xlu1 %v1357_v34, %s1369_s5 }
0x12c9   :  { %v926_v35 = vpop.permute.xlu1 %925 }
0x12ca   :  { %v928_v36 = vmul.f32 %v1355_v29, %v926_v35 }
0x12cc   :  { %930 = vrot.lane.b32.xlu0 %v928_v36, %s1370_s3 }
0x133e   :  { %v931_v37 = vpop.permute.xlu0 %930 }
0x133f   :  { %1086 = vst.msk [vmem:[%s1653_s6 + $0x30] sm:$0xff] %vm31_vm2, %v931_v37  ;;  %1242 = vmatmul.mubr.msk.f32.vlgmr.msra.gmra.mrb[8].mxu1 %vm31_vm2, %v931_v37 }
0x1412   :  { %v1005_v39 = vpop.f32.mrb[8].mxu1 }
0x1413   :  { %v1009_v40 = vadd.f32 %v1005_v39, %v179_v38  ;;  %v1243_v41 = vpop.f32.mrb[9].mxu1 }
0x1415   :  { %1358 = vtanh.f32 %v1009_v40  ;;  %v1088_v43 = vmul.f32 -1.442695, %v1009_v40 }
0x1417   :  { %1360 = vpow2.f32 %v1088_v43 }
0x141f   :  { %v1359_v42 = vpop.eup %1358 }
0x1420   :  { %1019 = vrot.lane.b32.xlu1 %v1359_v42, %s1369_s5 }
0x1421   :  { %v1361_v44 = vpop.eup %1360 }
0x1422   :  { %v1013_v45 = vadd.f32 1.0, %v1361_v44 }
0x1424   :  { %1362 = vrcp.f32 %v1013_v45 }
0x142e   :  { %v1363_v46 = vpop.eup %1362 }
0x142f   :  { %v1017_v49 = vmul.f32 %v1363_v46, %v922_v5 }
0x1492   :  { %v1020_v47 = vpop.permute.xlu1 %1019 }
0x1493   :  { %v1022_v48 = vmul.f32 %v1363_v46, %v1020_v47 }
0x1495   :  { %1024 = vrot.lane.b32.xlu0 %v1022_v48, %s1369_s5 }
0x1507   :  { %v1025_v50 = vpop.permute.xlu0 %1024 }
0x1508   :  { %v1027_v16 = vadd.f32 %v1025_v50, %v1017_v49 }
0x150a   :  { %1364 = vtanh.f32 %v1027_v16 }
0x1514   :  { %v1365_v3 = vpop.eup %1364 }
0x1515   :  { %1030 = vrot.lane.b32.xlu1 %v1365_v3, %s1369_s5 }
0x1519   :  { %1042 = vrot.lane.b32.xlu1 %v1027_v16, %s1371_s10 }
0x1587   :  { %v1031_v51 = vpop.permute.xlu1 %1030 }
0x1588   :  { %v1033_v52 = vmul.f32 %v1363_v46, %v1031_v51 }
0x158a   :  { %1035 = vrot.lane.b32.xlu0 %v1033_v52, %s1370_s3 }
0x158b   :  { %v1043_v53 = vpop.permute.xlu1 %1042 }
0x158c   :  { %1045 = vst.msk [vmem:[%s1651_s8] sm:$0xff] %vm31_vm2, %v1043_v53 }
0x15fc   :  { %v1036_v54 = vpop.permute.xlu0 %1035 }
0x15fd   :  { %1089 = vst.msk [vmem:[%s1653_s6 + $0x38] sm:$0xff] %vm31_vm2, %v1036_v54  ;;  %1040 = vst.msk [vmem:[%s1649_s7] sm:$0xff] %vm31_vm2, %v1036_v54 }

</bundles_post_ra>
